<compile_context>
chip_gen: v5e
topology: v5e:2x2
jax: 0.10.0
libtpu: 0.0.40
codegen_flags: <defaults>
</compile_context>

<pallas_src>
import functools

import jax
import jax.numpy as jnp
from jax.experimental import pallas as pl
from jax.experimental.pallas import tpu as pltpu


CHANNELS = (4, 8, 16, 32)   # Cin -> ... -> Cout
KERNEL_SIZE = 3


# -----------------------------------------------------------------------------
# Fused kernel: the whole Conv1d stack for one (batch, L-tile) grid point.
#   x_ref  : (1, Cin, Lp)            resident (j-invariant) input block
#   wb     : w_1, b_1, ..., w_n, b_n  with w_i : (Cout_i, K*Cin_i), b_i : (Cout_i, 1)
#   o_ref  : (1, Cout_n, tile_l)
#   win_ref: (Cin, tile_l + 2*halo)   VMEM scratch, zero-padded input window
# -----------------------------------------------------------------------------
def _fused_stack_kernel(x_ref, *rest, n_layers, K, tile_l, n_tiles, seq_len, halo):
    o_ref = rest[2 * n_layers]
    win_ref = rest[2 * n_layers + 1]
    wb = rest[:2 * n_layers]

    c_in = x_ref.shape[1]
    lw = tile_l + 2 * halo

    j = pl.program_id(1)
    t0 = j * tile_l
    if tile_l % 128 == 0:
        t0 = pl.multiple_of(t0, 128)

    zeros_halo = jnp.zeros((c_in, halo), jnp.float32)

    # --- Assemble this tile's zero-padded input window in VMEM scratch. -------
    # Replaces the old wrapper-side jnp.pad: no extra HBM pass over the input.
    if n_tiles == 1:
        # Single tile: tile_l == Lp == L, fully static assembly.
        win_ref[:, :halo] = zeros_halo
        win_ref[:, halo:halo + tile_l] = x_ref[0].astype(jnp.float32)
        win_ref[:, halo + tile_l:] = zeros_halo
    else:
        first = j == 0
        last = j == n_tiles - 1

        @pl.when(first)
        def _():
            win_ref[:, :halo] = zeros_halo
            win_ref[:, halo:] = x_ref[0, :, :tile_l + halo].astype(jnp.float32)

        @pl.when(last)
        def _():
            win_ref[:, :tile_l + halo] = x_ref[
                0, :, pl.ds(t0 - halo, tile_l + halo)].astype(jnp.float32)
            win_ref[:, tile_l + halo:] = zeros_halo

        @pl.when(jnp.logical_and(jnp.logical_not(first), jnp.logical_not(last)))
        def _():
            win_ref[...] = x_ref[0, :, pl.ds(t0 - halo, lw)].astype(jnp.float32)

    x = win_ref[...]                                       # (Cin, lw) f32

    # Hoisted position iota (sliced per layer) for the boundary masks.
    w_max = tile_l + 2 * (halo - (K // 2))
    pos = jax.lax.broadcasted_iota(jnp.int32, (1, w_max), 1)

    for i in range(n_layers):
        w2 = wb[2 * i][...]          # (Cout, K*Cin)
        b_ref = wb[2 * i + 1]        # (Cout, 1)
        cin = w2.shape[1] // K
        h = halo - (i + 1) * (K // 2)          # halo remaining after this layer
        n = tile_l + 2 * h                      # output width of this layer

        if cin % 8 == 0:
            # im2col merge: stack the K lane-shifted views along sublanes and do a
            # single MXU matmul (3x deeper contraction, 3x fewer MXU push/pop seqs).
            x2 = jnp.concatenate([x[:, k:k + n] for k in range(K)], axis=0)
            acc = jnp.dot(w2, x2, preferred_element_type=jnp.float32)
        else:
            # First layer (Cin=4): sublane-misaligned concat not worth the risk;
            # issue the K independent tap matmuls, then sum.
            taps = [jnp.dot(w2[:, k * cin:(k + 1) * cin], x[:, k:k + n],
                            preferred_element_type=jnp.float32)
                    for k in range(K)]
            acc = taps[0]
            for t in taps[1:]:
                acc = acc + t
        acc = acc + b_ref[...]                  # (Cout, 1) broadcasts over lanes

        if i < n_layers - 1:
            acc = jnp.maximum(acc, 0.0)         # ReLU between layers
            # Reproduce the reference's per-layer zero padding: intermediate
            # positions outside [0, L) must be exactly zero before the next layer
            # consumes them (only bites on edge tiles / the ragged-L pad region).
            g = (t0 - h) + pos[:, :n]
            acc = jnp.where((g >= 0) & (g < seq_len), acc, 0.0)
        x = acc

    o_ref[0] = x.astype(o_ref.dtype)


def _choose_tile_l(l_pad, l_out, batch):
    """Largest 128-aligned tile that divides the (padded) length, does not exceed the
    true output length, and leaves >= 2 grid steps (v7x megacore) when possible."""
    if l_pad < 128:
        return l_pad                 # tiny sequence: single full-width block
    for t in (2048, 1024, 512, 256, 128):
        if l_pad % t == 0 and t <= l_out and batch * (l_pad // t) >= 2:
            return t
    return 128                        # only hit for batch == 1 and l_pad == 128


# -----------------------------------------------------------------------------
# Wrapper: PyTorch NCL convention in and out, single pallas_call.
# -----------------------------------------------------------------------------
def processor_conv1d_stack(x_ncl, params):
    """x_ncl: (B, Cin, L) -> (B, Cout, L), like a PyTorch Conv1d(k=3, same) stack."""
    B, c_in, L = x_ncl.shape
    K = params[0][0].shape[0]
    n_layers = len(params)
    halo = n_layers * (K // 2)               # total receptive-field halo (3)
    c_out = params[-1][0].shape[1]

    # Ragged L only: pad the (small) input to the next 128 multiple so tiles stay
    # lane-aligned.  Output keeps length L; the overhanging last output block's
    # writes are masked by Pallas.  For 128-aligned L this is a no-op (no pad).
    if L >= 128:
        l_pad = ((L + 127) // 128) * 128
        x_in = x_ncl if l_pad == L else jnp.pad(
            x_ncl, ((0, 0), (0, 0), (0, l_pad - L)))
    else:
        l_pad = L
        x_in = x_ncl

    tile_l = _choose_tile_l(l_pad, L, B)
    n_tiles = l_pad // tile_l
    lw = tile_l + 2 * halo

    in_specs = [pl.BlockSpec((1, c_in, l_pad), lambda b, j: (b, 0, 0))]
    flat_args = [x_in]
    for w, bias in params:
        k, cout, cin = w.shape
        # Tap-merged (im2col) weight layout: (Cout, K*Cin), tap-major columns.
        w2 = jnp.transpose(w, (1, 0, 2)).reshape(cout, k * cin)
        in_specs.append(pl.BlockSpec((cout, k * cin), lambda b, j: (0, 0)))
        in_specs.append(pl.BlockSpec((cout, 1), lambda b, j: (0, 0)))
        flat_args.append(w2)
        flat_args.append(bias.reshape(-1, 1))

    kernel = functools.partial(
        _fused_stack_kernel, n_layers=n_layers, K=K, tile_l=tile_l,
        n_tiles=n_tiles, seq_len=L, halo=halo)

    flops = int(2 * B * L * sum(int(w.size) for w, _ in params))
    bytes_accessed = int(4 * (int(x_in.size) + B * c_out * L
                              + sum(int(w.size) + int(b.size)
                                    for w, b in params)))

    # VMEM budget: double-buffered resident input + output blocks, window scratch,
    # headroom for intermediates/spills.  Capped well below v7x's 64 MiB physical.
    # TODO(synk): for extremely long sequences, single-buffer the j-invariant input
    #             block (pl.Buffered(1)) or DMA it manually from pl.ANY.
    vmem_est = 4 * (2 * c_in * l_pad + 2 * c_out * tile_l
                    + c_in * lw + 4 * c_out * lw)
    vmem_limit = int(min(max(2 * vmem_est, 8 << 20), 48 << 20))

    return pl.pallas_call(
        kernel,
        out_shape=jax.ShapeDtypeStruct((B, c_out, L), x_ncl.dtype),
        grid=(B, n_tiles),
        in_specs=in_specs,
        out_specs=pl.BlockSpec((1, c_out, tile_l), lambda b, j: (b, 0, j)),
        scratch_shapes=[pltpu.VMEM((c_in, lw), jnp.float32)],
        compiler_params=pltpu.CompilerParams(
            dimension_semantics=("parallel", "parallel"),
            vmem_limit_bytes=vmem_limit),
        cost_estimate=pl.CostEstimate(
            flops=flops, transcendentals=0, bytes_accessed=bytes_accessed),
    )(*flat_args)


def init_params(key):
    params = []
    for i in range(len(CHANNELS) - 1):
        cin, cout = CHANNELS[i], CHANNELS[i + 1]
        key, kw, kb = jax.random.split(key, 3)
        scale = 1.0 / (cin * KERNEL_SIZE) ** 0.5
        # Weights stored tap-major, output-major: (K, Cout, Cin).
        w = jax.random.uniform(kw, (KERNEL_SIZE, cout, cin),
                               jnp.float32, -scale, scale)
        b = jax.random.uniform(kb, (cout,), jnp.float32, -scale, scale)
        params.append((w, b))
    return params


# -----------------------------------------------------------------------------
# Pure-JAX reference (for correctness check only)
# -----------------------------------------------------------------------------
def _ref_stack(x_ncl, params):
    y = x_ncl
    n_layers = len(params)
    for i, (w_koi, b) in enumerate(params):
        w_oik = jnp.transpose(w_koi, (1, 2, 0))     # (Cout, Cin, K)
        y = jax.lax.conv_general_dilated(
            y, w_oik, window_strides=(1,), padding=[(1, 1)],
            dimension_numbers=("NCH", "OIH", "NCH"),
            precision=jax.lax.Precision.HIGHEST)
        y = y + b[None, :, None]
        if i < n_layers - 1:
            y = jnp.maximum(y, 0.0)
    return y


if __name__ == "__main__":
    key = jax.random.PRNGKey(0)
    key, kp = jax.random.split(key)
    params = init_params(kp)

    # Small shapes covering: single-block path (demo shape), multi-tile path
    # (first/interior/last edge branches), and ragged L (pad + masked tail block).
    shapes = [(2, CHANNELS[0], 16),
              (1, CHANNELS[0], 384),
              (2, CHANNELS[0], 200)]

    for s in shapes:
        key, kx = jax.random.split(key)
        x = jax.random.normal(kx, s, jnp.float32)
        out = jax.block_until_ready(processor_conv1d_stack(x, params))
        ref = _ref_stack(x, params)
        assert out.shape == (s[0], CHANNELS[-1], s[2]), out.shape
        # MXU default f32 (multi-pass) vs XLA HIGHEST reference: small slack.
        assert jnp.allclose(out, ref, atol=2e-3, rtol=2e-3), f"mismatch at {s}"

    print("KERNEL_OK")
</pallas_src>

<mosaic_0001>
module attributes {stable_mosaic.version = 11 : i64} {
  func.func @_fused_stack_kernel(%arg0: i32, %arg1: i32, %arg2: memref<1x4x16xf32, #tpu.memory_space<vmem>>, %arg3: memref<8x12xf32, #tpu.memory_space<vmem>>, %arg4: memref<8x1xf32, #tpu.memory_space<vmem>>, %arg5: memref<16x24xf32, #tpu.memory_space<vmem>>, %arg6: memref<16x1xf32, #tpu.memory_space<vmem>>, %arg7: memref<32x48xf32, #tpu.memory_space<vmem>>, %arg8: memref<32x1xf32, #tpu.memory_space<vmem>>, %arg9: memref<1x32x16xf32, #tpu.memory_space<vmem>>, %arg10: memref<4x22xf32, #tpu.memory_space<vmem>>) attributes {dimension_semantics = [#tpu.dimension_semantics<parallel>, #tpu.dimension_semantics<parallel>], iteration_bounds = array<i64: 2, 1>, scalar_prefetch = 0 : i64, scratch_operands = 1 : i64, tpu.core_type = #tpu.core_type<tc>, window_params = [{transform_indices = @transform_0, window_bounds = array<i64: 1, 4, 16>}, {pipeline_mode = #tpu.pipeline_mode<synchronous>, transform_indices = @transform_1, window_bounds = array<i64: 8, 12>}, {pipeline_mode = #tpu.pipeline_mode<synchronous>, transform_indices = @transform_2, window_bounds = array<i64: 8, 1>}, {pipeline_mode = #tpu.pipeline_mode<synchronous>, transform_indices = @transform_3, window_bounds = array<i64: 16, 24>}, {pipeline_mode = #tpu.pipeline_mode<synchronous>, transform_indices = @transform_4, window_bounds = array<i64: 16, 1>}, {pipeline_mode = #tpu.pipeline_mode<synchronous>, transform_indices = @transform_5, window_bounds = array<i64: 32, 48>}, {pipeline_mode = #tpu.pipeline_mode<synchronous>, transform_indices = @transform_6, window_bounds = array<i64: 32, 1>}, {transform_indices = @transform_7, window_bounds = array<i64: 1, 32, 16>}]} {
    %c16_i32 = arith.constant 16 : i32
    %0 = arith.muli %arg1, %c16_i32 : i32
    %cst = arith.constant 0.000000e+00 : f32
    %1 = vector.broadcast %cst : f32 to vector<4x3xf32>
    %c0 = arith.constant 0 : index
    %c0_0 = arith.constant 0 : index
    %2 = vector.load %arg10[%c0, %c0_0] : memref<4x22xf32, #tpu.memory_space<vmem>>, vector<4x3xf32>
    tpu.vector_store %arg10[%c0, %c0_0], %1 {strides = array<i32>} : memref<4x22xf32, #tpu.memory_space<vmem>>, vector<4x3xf32>,
    %c0_1 = arith.constant 0 : index
    %c0_2 = arith.constant 0 : index
    %c0_3 = arith.constant 0 : index
    %3 = vector.load %arg2[%c0_1, %c0_2, %c0_3] : memref<1x4x16xf32, #tpu.memory_space<vmem>>, vector<1x4x16xf32>
    %4 = vector.shape_cast %3 : vector<1x4x16xf32> to vector<4x16xf32>
    %c0_4 = arith.constant 0 : index
    %c3 = arith.constant 3 : index
    %5 = vector.load %arg10[%c0_4, %c3] : memref<4x22xf32, #tpu.memory_space<vmem>>, vector<4x16xf32>
    tpu.vector_store %arg10[%c0_4, %c3], %4 {strides = array<i32>} : memref<4x22xf32, #tpu.memory_space<vmem>>, vector<4x16xf32>,
    %c0_5 = arith.constant 0 : index
    %c19 = arith.constant 19 : index
    %6 = vector.load %arg10[%c0_5, %c19] : memref<4x22xf32, #tpu.memory_space<vmem>>, vector<4x3xf32>
    tpu.vector_store %arg10[%c0_5, %c19], %1 {strides = array<i32>} : memref<4x22xf32, #tpu.memory_space<vmem>>, vector<4x3xf32>,
    %c0_6 = arith.constant 0 : index
    %c0_7 = arith.constant 0 : index
    %7 = vector.load %arg10[%c0_6, %c0_7] : memref<4x22xf32, #tpu.memory_space<vmem>>, vector<4x22xf32>
    %8 = tpu.iota {dimensions = array<i32: 1>} : vector<1x20xi32>
    %c0_8 = arith.constant 0 : index
    %c0_9 = arith.constant 0 : index
    %9 = vector.load %arg3[%c0_8, %c0_9] : memref<8x12xf32, #tpu.memory_space<vmem>>, vector<8x12xf32>
    %10 = vector.extract_strided_slice %9 {offsets = [0, 0], sizes = [8, 4], strides = [1, 1]} : vector<8x12xf32> to vector<8x4xf32>
    %11 = vector.extract_strided_slice %7 {offsets = [0, 0], sizes = [4, 20], strides = [1, 1]} : vector<4x22xf32> to vector<4x20xf32>
    %cst_10 = arith.constant dense<0.000000e+00> : vector<8x20xf32>
    %12 = tpu.matmul %10, %11, %cst_10 {dimension_numbers = #tpu.dot_dimension_numbers<[1], [0], [0], [1], [0, 0, 1, 1], [], []>} : vector<8x4xf32>, vector<4x20xf32>, vector<8x20xf32> -> vector<8x20xf32>
    %13 = vector.extract_strided_slice %9 {offsets = [0, 4], sizes = [8, 4], strides = [1, 1]} : vector<8x12xf32> to vector<8x4xf32>
    %14 = vector.extract_strided_slice %7 {offsets = [0, 1], sizes = [4, 20], strides = [1, 1]} : vector<4x22xf32> to vector<4x20xf32>
    %cst_11 = arith.constant dense<0.000000e+00> : vector<8x20xf32>
    %15 = tpu.matmul %13, %14, %cst_11 {dimension_numbers = #tpu.dot_dimension_numbers<[1], [0], [0], [1], [0, 0, 1, 1], [], []>} : vector<8x4xf32>, vector<4x20xf32>, vector<8x20xf32> -> vector<8x20xf32>
    %16 = vector.extract_strided_slice %9 {offsets = [0, 8], sizes = [8, 4], strides = [1, 1]} : vector<8x12xf32> to vector<8x4xf32>
    %17 = vector.extract_strided_slice %7 {offsets = [0, 2], sizes = [4, 20], strides = [1, 1]} : vector<4x22xf32> to vector<4x20xf32>
    %cst_12 = arith.constant dense<0.000000e+00> : vector<8x20xf32>
    %18 = tpu.matmul %16, %17, %cst_12 {dimension_numbers = #tpu.dot_dimension_numbers<[1], [0], [0], [1], [0, 0, 1, 1], [], []>} : vector<8x4xf32>, vector<4x20xf32>, vector<8x20xf32> -> vector<8x20xf32>
    %19 = arith.addf %12, %15 : vector<8x20xf32>
    %20 = arith.addf %19, %18 : vector<8x20xf32>
    %c0_13 = arith.constant 0 : index
    %c0_14 = arith.constant 0 : index
    %21 = vector.load %arg4[%c0_13, %c0_14] : memref<8x1xf32, #tpu.memory_space<vmem>>, vector<8x1xf32>
    %22 = vector.broadcast %21 : vector<8x1xf32> to vector<8x20xf32>
    %23 = arith.addf %20, %22 : vector<8x20xf32>
    %cst_15 = arith.constant 0.000000e+00 : f32
    %24 = vector.broadcast %cst_15 : f32 to vector<8x20xf32>
    %25 = arith.maximumf %23, %24 : vector<8x20xf32>
    %c2_i32 = arith.constant 2 : i32
    %26 = arith.subi %0, %c2_i32 : i32
    %27 = vector.broadcast %26 : i32 to vector<1x20xi32>
    %28 = arith.addi %27, %8 : vector<1x20xi32>
    %c0_i32 = arith.constant 0 : i32
    %29 = vector.broadcast %c0_i32 : i32 to vector<1x20xi32>
    %30 = arith.cmpi sge, %28, %29 : vector<1x20xi32>
    %c16_i32_16 = arith.constant 16 : i32
    %31 = vector.broadcast %c16_i32_16 : i32 to vector<1x20xi32>
    %32 = arith.cmpi slt, %28, %31 : vector<1x20xi32>
    %33 = arith.andi %30, %32 : vector<1x20xi1>
    %cst_17 = arith.constant 0.000000e+00 : f32
    %34 = vector.shape_cast %33 : vector<1x20xi1> to vector<1x20xi1>
    %35 = vector.broadcast %34 : vector<1x20xi1> to vector<8x20xi1>
    %36 = vector.broadcast %cst_17 : f32 to vector<8x20xf32>
    %37 = arith.select %35, %25, %36 : vector<8x20xi1>, vector<8x20xf32>
    %c0_18 = arith.constant 0 : index
    %c0_19 = arith.constant 0 : index
    %38 = vector.load %arg5[%c0_18, %c0_19] : memref<16x24xf32, #tpu.memory_space<vmem>>, vector<16x24xf32>
    %39 = vector.extract_strided_slice %37 {offsets = [0, 0], sizes = [8, 18], strides = [1, 1]} : vector<8x20xf32> to vector<8x18xf32>
    %40 = vector.extract_strided_slice %37 {offsets = [0, 1], sizes = [8, 18], strides = [1, 1]} : vector<8x20xf32> to vector<8x18xf32>
    %41 = vector.extract_strided_slice %37 {offsets = [0, 2], sizes = [8, 18], strides = [1, 1]} : vector<8x20xf32> to vector<8x18xf32>
    %42 = tpu.concatenate %39, %40, %41 in 0 : vector<8x18xf32>, vector<8x18xf32>, vector<8x18xf32> -> vector<24x18xf32>
    %cst_20 = arith.constant dense<0.000000e+00> : vector<16x18xf32>
    %43 = tpu.matmul %38, %42, %cst_20 {dimension_numbers = #tpu.dot_dimension_numbers<[1], [0], [0], [1], [0, 0, 1, 1], [], []>} : vector<16x24xf32>, vector<24x18xf32>, vector<16x18xf32> -> vector<16x18xf32>
    %c0_21 = arith.constant 0 : index
    %c0_22 = arith.constant 0 : index
    %44 = vector.load %arg6[%c0_21, %c0_22] : memref<16x1xf32, #tpu.memory_space<vmem>>, vector<16x1xf32>
    %45 = vector.broadcast %44 : vector<16x1xf32> to vector<16x18xf32>
    %46 = arith.addf %43, %45 : vector<16x18xf32>
    %cst_23 = arith.constant 0.000000e+00 : f32
    %47 = vector.broadcast %cst_23 : f32 to vector<16x18xf32>
    %48 = arith.maximumf %46, %47 : vector<16x18xf32>
    %c1_i32 = arith.constant 1 : i32
    %49 = arith.subi %0, %c1_i32 : i32
    %50 = vector.extract_strided_slice %8 {offsets = [0, 0], sizes = [1, 18], strides = [1, 1]} : vector<1x20xi32> to vector<1x18xi32>
    %51 = vector.broadcast %49 : i32 to vector<1x18xi32>
    %52 = arith.addi %51, %50 : vector<1x18xi32>
    %c0_i32_24 = arith.constant 0 : i32
    %53 = vector.broadcast %c0_i32_24 : i32 to vector<1x18xi32>
    %54 = arith.cmpi sge, %52, %53 : vector<1x18xi32>
    %c16_i32_25 = arith.constant 16 : i32
    %55 = vector.broadcast %c16_i32_25 : i32 to vector<1x18xi32>
    %56 = arith.cmpi slt, %52, %55 : vector<1x18xi32>
    %57 = arith.andi %54, %56 : vector<1x18xi1>
    %cst_26 = arith.constant 0.000000e+00 : f32
    %58 = vector.shape_cast %57 : vector<1x18xi1> to vector<1x18xi1>
    %59 = vector.broadcast %58 : vector<1x18xi1> to vector<16x18xi1>
    %60 = vector.broadcast %cst_26 : f32 to vector<16x18xf32>
    %61 = arith.select %59, %48, %60 : vector<16x18xi1>, vector<16x18xf32>
    %c0_27 = arith.constant 0 : index
    %c0_28 = arith.constant 0 : index
    %62 = vector.load %arg7[%c0_27, %c0_28] : memref<32x48xf32, #tpu.memory_space<vmem>>, vector<32x48xf32>
    %63 = vector.extract_strided_slice %61 {offsets = [0, 0], sizes = [16, 16], strides = [1, 1]} : vector<16x18xf32> to vector<16x16xf32>
    %64 = vector.extract_strided_slice %61 {offsets = [0, 1], sizes = [16, 16], strides = [1, 1]} : vector<16x18xf32> to vector<16x16xf32>
    %65 = vector.extract_strided_slice %61 {offsets = [0, 2], sizes = [16, 16], strides = [1, 1]} : vector<16x18xf32> to vector<16x16xf32>
    %66 = tpu.concatenate %63, %64, %65 in 0 : vector<16x16xf32>, vector<16x16xf32>, vector<16x16xf32> -> vector<48x16xf32>
    %cst_29 = arith.constant dense<0.000000e+00> : vector<32x16xf32>
    %67 = tpu.matmul %62, %66, %cst_29 {dimension_numbers = #tpu.dot_dimension_numbers<[1], [0], [0], [1], [0, 0, 1, 1], [], []>} : vector<32x48xf32>, vector<48x16xf32>, vector<32x16xf32> -> vector<32x16xf32>
    %c0_30 = arith.constant 0 : index
    %c0_31 = arith.constant 0 : index
    %68 = vector.load %arg8[%c0_30, %c0_31] : memref<32x1xf32, #tpu.memory_space<vmem>>, vector<32x1xf32>
    %69 = vector.broadcast %68 : vector<32x1xf32> to vector<32x16xf32>
    %70 = arith.addf %67, %69 : vector<32x16xf32>
    %c0_32 = arith.constant 0 : index
    %c0_33 = arith.constant 0 : index
    %c0_34 = arith.constant 0 : index
    %71 = vector.load %arg9[%c0_32, %c0_33, %c0_34] : memref<1x32x16xf32, #tpu.memory_space<vmem>>, vector<1x32x16xf32>
    %72 = vector.shape_cast %71 : vector<1x32x16xf32> to vector<32x16xf32>
    %73 = vector.shape_cast %70 : vector<32x16xf32> to vector<1x32x16xf32>
    tpu.vector_store %arg9[%c0_32, %c0_33, %c0_34], %73 {strides = array<i32>} : memref<1x32x16xf32, #tpu.memory_space<vmem>>, vector<1x32x16xf32>,
    return
  }
  func.func @transform_0(%arg0: i32, %arg1: i32) -> (i32, i32, i32) {
    %c0_i32 = arith.constant 0 : i32
    %c0_i32_0 = arith.constant 0 : i32
    %c0_i32_1 = arith.constant 0 : i32
    return %arg0, %c0_i32, %c0_i32_0 : i32, i32, i32
  }
  func.func @transform_1(%arg0: i32, %arg1: i32) -> (i32, i32) {
    %c0_i32 = arith.constant 0 : i32
    %c0_i32_0 = arith.constant 0 : i32
    %c0_i32_1 = arith.constant 0 : i32
    return %c0_i32, %c0_i32_0 : i32, i32
  }
  func.func @transform_2(%arg0: i32, %arg1: i32) -> (i32, i32) {
    %c0_i32 = arith.constant 0 : i32
    %c0_i32_0 = arith.constant 0 : i32
    %c0_i32_1 = arith.constant 0 : i32
    return %c0_i32, %c0_i32_0 : i32, i32
  }
  func.func @transform_3(%arg0: i32, %arg1: i32) -> (i32, i32) {
    %c0_i32 = arith.constant 0 : i32
    %c0_i32_0 = arith.constant 0 : i32
    %c0_i32_1 = arith.constant 0 : i32
    return %c0_i32, %c0_i32_0 : i32, i32
  }
  func.func @transform_4(%arg0: i32, %arg1: i32) -> (i32, i32) {
    %c0_i32 = arith.constant 0 : i32
    %c0_i32_0 = arith.constant 0 : i32
    %c0_i32_1 = arith.constant 0 : i32
    return %c0_i32, %c0_i32_0 : i32, i32
  }
  func.func @transform_5(%arg0: i32, %arg1: i32) -> (i32, i32) {
    %c0_i32 = arith.constant 0 : i32
    %c0_i32_0 = arith.constant 0 : i32
    %c0_i32_1 = arith.constant 0 : i32
    return %c0_i32, %c0_i32_0 : i32, i32
  }
  func.func @transform_6(%arg0: i32, %arg1: i32) -> (i32, i32) {
    %c0_i32 = arith.constant 0 : i32
    %c0_i32_0 = arith.constant 0 : i32
    %c0_i32_1 = arith.constant 0 : i32
    return %c0_i32, %c0_i32_0 : i32, i32
  }
  func.func @transform_7(%arg0: i32, %arg1: i32) -> (i32, i32, i32) {
    %c0_i32 = arith.constant 0 : i32
    %c0_i32_0 = arith.constant 0 : i32
    return %arg0, %c0_i32, %arg1 : i32, i32, i32
  }
}

</mosaic_0001>

<bundles_post_ra>
// kernel: tpu_custom_call.1
= control target key start
LH: loop header
LB: loop body
LE: loop exit
PB: predicated region body
PF: predicated region fallthrough
CT: control target
= control target key end

     0   :  { %12 = vsyncpa [#allocation4], 0  ;;  %s872_s24 = smov 0   ;;  %s874_s25 = smov 0   ;;  %s984_s0 = inlined_call_operand.vmem [shape: f32[2,4,16], index: 0, kind: input, shape index: {}]   ;;  %s985_s1 = inlined_call_operand.hbm [shape: f32[8,12], index: 1, kind: input, shape index: {}]   ;;  %s986_s2 = inlined_call_operand.vmem [shape: f32[8,1], index: 2, kind: input, shape index: {}]   ;;  %s987_s3 = inlined_call_operand.vmem [shape: f32[16,24], index: 3, kind: input, shape index: {}]   ;;  %s988_s4 = inlined_call_operand.vmem [shape: f32[16,1], index: 4, kind: input, shape index: {}]   ;;  %s989_s5 = inlined_call_operand.vmem [shape: f32[32,48], index: 5, kind: input, shape index: {}]   ;;  %s990_s6 = inlined_call_operand.vmem [shape: f32[32,1], index: 6, kind: input, shape index: {}]   ;;  %s991_s7 = inlined_call_operand.vmem [shape: f32[2,32,16], index: 7, kind: output, shape index: {}]  }
   0x1   :  { %s876_s26 = smov 0  }
   0x2 LB: > { %s671_s27 = sadd.s32 4294967295, %s822_s26   ;;  %s30_s28 = sadd.s32 1, %s818_s25  ;;  %s822_s26 = sphi %s876_s26, %s18_s26   ;;  %s818_s25 = sphi %s874_s25, %s995_s25   ;;  %s814_s24 = sphi %s872_s24, %s994_s24  }
   0x3   : > { %p32_p0 = scmp.ge.s32.totalorder %s30_s28, 2  ;;  %p673_p1 = scmp.ge.s32.totalorder %s822_s26, 1 }
   0x4   : > { %p215_p2 = scmp.lt.s32.totalorder %s822_s26, 3  ;;  %p719_p4 = scmp.eq.s32.totalorder %s671_s27, 0 }
   0x5   : > { %s997_s28 = smov (%p32_p0, %s30_s28), 0  ;;  %s227_s8 = sshll.u32 %s985_s1, 4  ;;  %s228_s8 = int_to_ptr.hbm [resolvable:$true] %s227_s8 }
   0x6   : > { %p216_p3 = pnand %p673_p1, %p215_p2  ;;  %s824_s9 = smov [#allocation3]  }
   0x7   : > { %s229_s10 = sshll.u32 %s824_s9, 4  ;;  %s230_s10 = int_to_ptr.vmem [resolvable:$true] %s229_s10 }
   0x8   : > { %p715_p5 = pneg %p216_p3  ;;  %264 = sbr.rel (%p216_p3) target bundleno = 928 (0x3a0), region = 48 }
   0xa   : > { %p716_p6 = pnand %p719_p4, %p715_p5 }
   0xc   : > { %718 = dma.hbm_to_vmem [thread:$0]  (!%p716_p6), %s228_s8, 128, %s230_s10, [#allocation4]  }
   0xd   : > { %809 = dma.done.wait (%p719_p4), [#allocation4], 128  }
   0xe   : > { %811 = vsyncadd (%p719_p4), [#allocation4], 4294967168  ;;  %p299_p7 = scmp.lt.s32.totalorder %s814_s24, 1  ;;  %vm312_vm0 = vcmask 19456   ;;  %v825_v0 = vmov 0.0   ;;  %s826_s15 = smov 3   ;;  %v324_v12 = vlaneseq }
   0xf   : > { %313 = vst.msk [vmem:[#allocation2] sm:$0xf] %vm312_vm0, %v825_v0  ;;  %v326_v2 = vld [vmem:[#allocation3] sm:$0xff]  ;;  %s827_s16 = smov 124   ;;  %s828_s17 = smov 120   ;;  %vm319_vm1 = vcmask 150552  }
  0x10   : > { %s999_s24 = smov (!%p299_p7, %s814_s24), 1  ;;  %328 = vrot.lane.b32.xlu1 %v326_v2, %s827_s16  ;;  %359 = vrot.lane.b32.xlu2 %v326_v2, %s828_s17  ;;  %vm321_vm2 = vcmask 175256   ;;  %s829_s18 = smov 127   ;;  %vm336_vm3 = vcmask 1043456   ;;  %vm333_vm4 = vcmask 31744   ;;  %v412_v5 = vld [vmem:[%s986_s2] sm:$0xff] }
  0x11   : > { %s678_s11 = sshll.u32 %s999_s24, 2  ;;  %s830_s19 = smov 126   ;;  %v831_v6 = vmov 0   ;;  %v439_v7 = vld [vmem:[%s988_s4 + $0x8] sm:$0xff]  ;;  %v325_v13 = vand.u32 127, %v324_v12  ;;  %v438_v24 = vld [vmem:[%s988_s4] sm:$0xff] }
  0x12   : > { %s302_s14 = scalar_lea.vmem %s984_s0, %s678_s11  ;;  %753 = vset.pattern.permute.xlu2 %v831_v6  ;;  %754 = vset.pattern.permute.xlu0 %v831_v6  ;;  %v512_v25 = vld [vmem:[%s990_s6 + $0x10] sm:$0xff]  ;;  %v429_v28 = vld [vmem:[%s987_s3] sm:$0xff]  ;;  %vm450_vm8 = vcmask 195584   ;;  %v430_v29 = vld [vmem:[%s987_s3 + $0x8] sm:$0xff]  ;;  %vm534_vm12 = vcmask 392192   ;;  %s698_s8 = sshll.u32 %s999_s24, 5 }
  0x13   : > { %v314_v1 = vld [vmem:[%s302_s14] sm:$0xf]  ;;  %765 = vset.pattern.permute.xlu1 %v831_v6  ;;  %v422_v15 = vadd.s32 4294967294, %v325_v13  ;;  %v484_v32 = vadd.s32 4294967295, %v325_v13  ;;  %v511_v43 = vld [vmem:[%s990_s6 + $0x8] sm:$0xff]  ;;  %v513_v45 = vld [vmem:[%s990_s6 + $0x18] sm:$0xff]  ;;  %s310_s11 = scalar_lea.vmem %s991_s7, %s698_s8 }
  0x14   : > { %316 = vrot.lane.b32.xlu0 %v314_v1, %s826_s15  ;;  %v510_v44 = vld [vmem:[%s990_s6] sm:$0xff]  ;;  %v493_v53 = vld [vmem:[%s989_s5 + $0x8] sm:$0xff]  ;;  %v495_v54 = vld [vmem:[%s989_s5 + $0x18] sm:$0xff]  ;;  %vm576_vm13 = vcmask 130048  }
  0x15   : > { %vm423_vm5 = vcmp.ge.s32.totalorder %v422_v15, 0  ;;  %vm424_vm6 = vcmp.lt.s32.totalorder %v422_v15, 16  ;;  %vm485_vm9 = vcmp.ge.s32.totalorder %v484_v32, 0  ;;  %vm486_vm10 = vcmp.lt.s32.totalorder %v484_v32, 16  ;;  %v492_v52 = vld [vmem:[%s989_s5] sm:$0xff]  ;;  %v494_v55 = vld [vmem:[%s989_s5 + $0x10] sm:$0xff] }
  0x16   : > { %vm425_vm7 = vmand %vm423_vm5, %vm424_vm6 }
  0x17   : > { %vm928_vm11 = vmand %vm485_vm9, %vm486_vm10 }
  0x18   : > { %415 = vperm.xlu2 %753, %v412_v5  }
  0x20   : > { %447 = vperm.xlu2 %753, %v439_v7  }
  0x6a   : > { %v360_v9 = vpop.permute.xlu2 %359 }
  0x72   : > { %v416_v20 = vpop.permute.xlu2 %415 }
  0x7a   : > { %v448_v34 = vpop.permute.xlu2 %447 }
  0x82   : > { %v329_v8 = vpop.permute.xlu1 %328 }
  0x86   : > { %v317_v3 = vpop.permute.xlu0 %316 }
  0x87   : > { %320 = vst.msk [vmem:[#allocation2] sm:$0xf] %vm319_vm1, %v317_v3 }
  0x88   : > { %322 = vst.msk [vmem:[#allocation2] sm:$0xf] %vm321_vm2, %v825_v0 }
  0x8f   : > { %v323_v4 = vld [vmem:[#allocation2] sm:$0xf] }
  0x90   : > { %331 = vrot.lane.b32.xlu0 %v323_v4, %s829_s18  ;;  %361 = vrot.lane.b32.xlu1 %v323_v4, %s830_s19 }
  0x91   : > { %685 = vmatpush.msk.msra.mxu2 %vm336_vm3, %v323_v4 }
  0x92   : > { %686 = vmatmul.msk.f32.vlgmr.msra.gmra.mxu2 %vm333_vm4, %v326_v2 }
 0x102   : > { %v332_v10 = vpop.permute.xlu0 %331  ;;  %v362_v11 = vpop.permute.xlu1 %361 }
 0x103   : > { %681 = vmatpush.msk.msra.mxu0 %vm336_vm3, %v332_v10  ;;  %683 = vmatpush.msk.msra.mxu1 %vm336_vm3, %v362_v11 }
 0x104   : > { %682 = vmatmul.msk.f32.vlgmr.msra.gmra.mxu0 %vm333_vm4, %v329_v8  ;;  %684 = vmatmul.msk.f32.vlgmr.msra.gmra.mxu1 %vm333_vm4, %v360_v9 }
 0x115   : > { %v408_v14 = vpop.f32.mrf.mxu2 }
 0x181   : > { %v356_v16 = vpop.f32.mrf.mxu0  ;;  %v384_v17 = vpop.f32.mrf.mxu1 }
 0x182   : > { %v409_v18 = vadd.f32 %v408_v14, %v356_v16 }
 0x184   : > { %v411_v19 = vadd.f32 %v409_v18, %v384_v17 }
 0x186   : > { %v418_v21 = vadd.f32 %v416_v20, %v411_v19 }
 0x188   : > { %v419_v22 = vmax.f32 %v418_v21, 0.0 }
 0x18a   : > { %v428_v23 = vsel %vm425_vm7, %v419_v22, 0.0 }
 0x18b   : > { %432 = vrot.lane.b32.xlu1 %v428_v23, %s829_s18  ;;  %435 = vrot.lane.b32.xlu0 %v428_v23, %s830_s19 }
 0x193   : > { %442 = vperm.xlu0 %754, %v438_v24  }
 0x19b   : > { %526 = vperm.xlu0 %754, %v512_v25  }
 0x1fd   : > { %v436_v26 = vpop.permute.xlu0 %435  ;;  %v433_v27 = vpop.permute.xlu1 %432 }
 0x1fe   : > { %470 = vmatpush.msra.mxu3 %v436_v26 }
 0x200   : > { %471 = vmatpush.msra.mxu3 %v433_v27 }
 0x202   : > { %687 = vmatpush.msk.msra.mxu3 %vm425_vm7, %v419_v22 }
 0x203   : > { %688 = vmatmul.msk.f32.vlgmr.msra.gmra.mxu3 %vm450_vm8, %v429_v28 }
 0x205   : > { %v443_v31 = vpop.permute.xlu0 %442 }
 0x20b   : > { %689 = vmatmul.msk.f32.gmra.mxu3 %vm450_vm8, %v430_v29 }
 0x20d   : > { %v527_v1 = vpop.permute.xlu0 %526 }
 0x286   : > { %v474_v30 = vpop.f32.mrf.mxu3 }
 0x287   : > { %v475_v33 = vadd.f32 %v474_v30, %v443_v31 }
 0x289   : > { %v480_v36 = vmax.f32 %v475_v33, 0.0 }
 0x28b   : > { %v490_v40 = vsel %vm928_vm11, %v480_v36, 0.0 }
 0x28e   : > { %v477_v35 = vpop.f32.mrf.mxu3 }
 0x28f   : > { %v478_v37 = vadd.f32 %v477_v35, %v448_v34 }
 0x291   : > { %v481_v39 = vmax.f32 %v478_v37, 0.0 }
 0x293   : > { %v491_v41 = vsel %vm928_vm11, %v481_v39, 0.0 }
 0x294   : > { %v760_v42 = vpack.i.bf16 %v490_v40, %v491_v41 }
 0x296   : > { %761 = vrot.lane.b32.xlu2 %v760_v42, %s829_s18  ;;  %756 = vrot.lane.b32.xlu1 %v760_v42, %s830_s19 }
 0x29e   : > { %521 = vperm.xlu2 %753, %v511_v43   ;;  %516 = vperm.xlu1 %765, %v510_v44  }
 0x2a6   : > { %531 = vperm.xlu1 %765, %v513_v45  }
 0x2f0   : > { %v762_v48 = vpop.permute.xlu2 %761 }
 0x2f1   : > { %v763_v50 = vunpack.i.l.bf16 %v762_v48  ;;  %v764_v51 = vunpack.i.h.bf16 %v762_v48 }
 0x2f8   : > { %v522_v58 = vpop.permute.xlu2 %521 }
 0x308   : > { %v757_v46 = vpop.permute.xlu1 %756 }
 0x309   : > { %v758_v47 = vunpack.i.l.bf16 %v757_v46  ;;  %v759_v49 = vunpack.i.h.bf16 %v757_v46 }
 0x30b   : > { %557 = vmatpush.msrb.mxu0 %v758_v47  ;;  %699 = vmatpush.msrb.mxu1 %v758_v47 }
 0x30c   : > { %700 = vmatpush.msrb.mxu2 %v758_v47 }
 0x30d   : > { %558 = vmatpush.msrb.mxu0 %v759_v49  ;;  %701 = vmatpush.msrb.mxu1 %v759_v49 }
 0x30e   : > { %702 = vmatpush.msrb.mxu2 %v759_v49 }
 0x30f   : > { %559 = vmatpush.msrb.mxu0 %v763_v50  ;;  %703 = vmatpush.msrb.mxu1 %v763_v50 }
 0x310   : > { %704 = vmatpush.msrb.mxu2 %v763_v50  ;;  %v517_v56 = vpop.permute.xlu1 %516 }
 0x311   : > { %560 = vmatpush.msrb.mxu0 %v764_v51  ;;  %705 = vmatpush.msrb.mxu1 %v764_v51 }
 0x312   : > { %706 = vmatpush.msrb.mxu2 %v764_v51 }
 0x313   : > { %690 = vmatpush.msk.msrb.mxu0 %vm928_vm11, %v481_v39  ;;  %707 = vmatpush.msk.msrb.mxu1 %vm928_vm11, %v481_v39 }
 0x314   : > { %708 = vmatpush.msk.msrb.mxu2 %vm928_vm11, %v481_v39 }
 0x315   : > { %691 = vmatpush.msk.msrb.mxu0 %vm928_vm11, %v480_v36  ;;  %709 = vmatpush.msk.msrb.mxu1 %vm928_vm11, %v480_v36 }
 0x316   : > { %710 = vmatpush.msk.msrb.mxu2 %vm928_vm11, %v480_v36  ;;  %692 = vmatmul.msk.f32.vlgmr.msrb.gmra.mxu0 %vm534_vm12, %v492_v52 }
 0x317   : > { %693 = vmatmul.msk.f32.vlgmr.msrb.gmra.mxu1 %vm534_vm12, %v493_v53  ;;  %695 = vmatmul.msk.f32.vlgmr.msrb.gmra.mxu2 %vm534_vm12, %v495_v54 }
 0x318   : > { %v532_v62 = vpop.permute.xlu1 %531 }
 0x31f   : > { %694 = vmatmul.msk.f32.gmra.mxu1 %vm534_vm12, %v494_v55 }
 0x393   : > { %v564_v57 = vpop.f32.mrf.mxu0 }
 0x394   : > { %v565_v59 = vadd.f32 %v564_v57, %v517_v56  ;;  %v567_v60 = vpop.f32.mrf.mxu1 }
 0x395   : > { %v568_v61 = vadd.f32 %v567_v60, %v522_v58 }
 0x396   : > { %577 = vst.msk [vmem:[%s310_s11] sm:$0xff] %vm576_vm13, %v565_v59 }
 0x397   : > { %578 = vst.msk [vmem:[%s310_s11 + $0x8] sm:$0xff] %vm576_vm13, %v568_v61 }
 0x39a   : > { %v573_v63 = vpop.f32.mrf.mxu2 }
 0x39b   : > { %v574_v0 = vadd.f32 %v573_v63, %v532_v62 }
 0x39c   : > { %v570_v2 = vpop.f32.mrf.mxu1 }
 0x39d   : > { %580 = vst.msk [vmem:[%s310_s11 + $0x18] sm:$0xff] %vm576_vm13, %v574_v0  ;;  %v571_v3 = vadd.f32 %v570_v2, %v527_v1 }
 0x39f   : > { %579 = vst.msk [vmem:[%s310_s11 + $0x10] sm:$0xff] %vm576_vm13, %v571_v3 }
 0x3a0 PF: > { %s18_s26 = sadd.s32 1, %s822_s26   ;;  %s994_s24 = smov %s818_s25 }
 0x3a1   : > { %p15_p8 = scmp.ge.s32.totalorder %s18_s26, 4   ;;  %s995_s25 = smov %s997_s28 }
 0x3a3   :  { %17 = sbr.rel (!%p15_p8) target bundleno = 2 (0x2), region = 83 }
 0x3a8   :  { %608 = vsyncpa [#allocation4], 1 }
 0x3a9   :  { %610 = vsyncpa [#allocation4 + $0x1], 1 }

</bundles_post_ra>
